<compile_context>
chip_gen: v7x
topology: tpu7x:2x2x1
jax: 0.10.0
libtpu: 0.0.40
codegen_flags: <defaults>
</compile_context>

<pallas_src>
import functools

import jax
import jax.numpy as jnp
from jax.experimental import pallas as pl
from jax.experimental.pallas import tpu as pltpu


def _round_up(x: int, m: int) -> int:
    return ((x + m - 1) // m) * m


def qnetwork_kernel(x_ref, w1_ref, b1_ref, w2_ref, b2_ref, out_ref):
    # hidden = relu(x @ W1 + b1)   (bf16 inputs, f32 accumulate, f32 bias/ReLU)
    h = jnp.dot(x_ref[...], w1_ref[...], preferred_element_type=jnp.float32)
    h = jnp.maximum(h + b1_ref[...], 0.0)        # b1 is (1, Hp) -> broadcasts
    # out = hidden @ W2 + b2   (cast hidden back to bf16 for the second MXU pass)
    o = jnp.dot(h.astype(w2_ref.dtype), w2_ref[...],
                preferred_element_type=jnp.float32)
    o = o + b2_ref[...]                          # b2 is (1, Ap) -> broadcasts
    out_ref[...] = o.astype(out_ref.dtype)


@functools.partial(jax.jit, static_argnames=("block_b",))
def qnetwork_forward(x, w1, b1, w2, b2, *, block_b: int = 512):
    """x: [B, state_dim]; w1: [state_dim, hidden]; b1: [hidden];
    w2: [hidden, action]; b2: [action]. Returns f32 [B, action]."""
    B, S = x.shape
    H = w1.shape[1]
    A = w2.shape[1]

    # --- lane-dense padding of feature dims (hidden / action -> x128) -------
    Hp = _round_up(H, 128)
    Ap = _round_up(A, 128)

    # --- batch tiling --------------------------------------------------------
    tb = min(block_b, _round_up(B, 8))
    tb = _round_up(tb, 8)
    Bp = _round_up(B, tb)
    grid = (pl.cdiv(Bp, tb),)

    compute_dtype = jnp.bfloat16

    # Pad + cast inputs.  Zero-padded hidden columns stay exactly 0 through
    # bias/ReLU and feed zero rows of w2; zero-padded action columns come out
    # exactly 0 and are sliced away below, so semantics match the PyTorch module.
    x_p = jnp.zeros((Bp, S), compute_dtype).at[:B, :].set(x.astype(compute_dtype))
    w1_p = jnp.zeros((S, Hp), compute_dtype).at[:, :H].set(w1.astype(compute_dtype))
    b1_p = jnp.zeros((1, Hp), jnp.float32).at[0, :H].set(b1.astype(jnp.float32))
    w2_p = jnp.zeros((Hp, Ap), compute_dtype).at[:H, :A].set(w2.astype(compute_dtype))
    b2_p = jnp.zeros((1, Ap), jnp.float32).at[0, :A].set(b2.astype(jnp.float32))

    out_padded = pl.pallas_call(
        qnetwork_kernel,
        out_shape=jax.ShapeDtypeStruct((Bp, Ap), jnp.float32),
        grid=grid,
        in_specs=[
            pl.BlockSpec((tb, S), lambda i: (i, 0)),     # x: tiled over batch
            pl.BlockSpec((S, Hp), lambda i: (0, 0)),     # w1: VMEM-resident
            pl.BlockSpec((1, Hp), lambda i: (0, 0)),     # b1: VMEM-resident
            pl.BlockSpec((Hp, Ap), lambda i: (0, 0)),    # w2: VMEM-resident
            pl.BlockSpec((1, Ap), lambda i: (0, 0)),     # b2: VMEM-resident
        ],
        out_specs=pl.BlockSpec((tb, Ap), lambda i: (i, 0)),
        compiler_params=pltpu.CompilerParams(
            dimension_semantics=("parallel",),           # shards across TCs on v7x
        ),
    )(x_p, w1_p, b1_p, w2_p, b2_p)

    return out_padded[:B, :A]


def _reference(x, w1, b1, w2, b2):
    """Pure-JAX reference with the same bf16 input rounding / f32 accumulation."""
    bf = lambda a: a.astype(jnp.bfloat16).astype(jnp.float32)
    h = jnp.maximum(bf(x) @ bf(w1) + b1, 0.0)
    return bf(h) @ bf(w2) + b2


if __name__ == "__main__":
    # Small shapes consistent with QNetwork(state_dim, action_dim, hidden_dim)
    state_dim, action_dim, hidden_dim = 16, 8, 32
    batch = 4

    key = jax.random.PRNGKey(0)
    kx, kw1, kb1, kw2, kb2 = jax.random.split(key, 5)

    x = jax.random.normal(kx, (batch, state_dim), dtype=jnp.float32)
    lim1 = 1.0 / (state_dim ** 0.5)
    w1 = jax.random.uniform(kw1, (state_dim, hidden_dim), minval=-lim1, maxval=lim1,
                            dtype=jnp.float32)
    b1 = jax.random.uniform(kb1, (hidden_dim,), minval=-lim1, maxval=lim1,
                            dtype=jnp.float32)
    lim2 = 1.0 / (hidden_dim ** 0.5)
    w2 = jax.random.uniform(kw2, (hidden_dim, action_dim), minval=-lim2, maxval=lim2,
                            dtype=jnp.float32)
    b2 = jax.random.uniform(kb2, (action_dim,), minval=-lim2, maxval=lim2,
                            dtype=jnp.float32)

    # --- small-batch run (grid = 1 step) -------------------------------------
    out = jax.block_until_ready(qnetwork_forward(x, w1, b1, w2, b2))
    ref = _reference(x, w1, b1, w2, b2)
    assert out.shape == (batch, action_dim)
    assert jnp.allclose(out, ref, atol=1e-3, rtol=1e-3)

    # --- larger batch: exercises batch tiling, padding remainder, pipelining --
    big_b = 1000
    xb = jax.random.normal(jax.random.PRNGKey(1), (big_b, state_dim), jnp.float32)
    out_b = jax.block_until_ready(qnetwork_forward(xb, w1, b1, w2, b2, block_b=256))
    ref_b = _reference(xb, w1, b1, w2, b2)
    assert out_b.shape == (big_b, action_dim)
    assert jnp.allclose(out_b, ref_b, atol=1e-3, rtol=1e-3)

    print("KERNEL_OK")
</pallas_src>

<mosaic_0001>
module attributes {stable_mosaic.version = 11 : i64} {
  func.func @qnetwork_kernel(%arg0: i32, %arg1: memref<8x16xbf16, #tpu.memory_space<vmem>>, %arg2: memref<16x128xbf16, #tpu.memory_space<vmem>>, %arg3: memref<1x128xf32, #tpu.memory_space<vmem>>, %arg4: memref<128x128xbf16, #tpu.memory_space<vmem>>, %arg5: memref<1x128xf32, #tpu.memory_space<vmem>>, %arg6: memref<8x128xf32, #tpu.memory_space<vmem>>) attributes {dimension_semantics = [#tpu.dimension_semantics<parallel>], iteration_bounds = array<i64: 1>, scalar_prefetch = 0 : i64, scratch_operands = 0 : i64, tpu.core_type = #tpu.core_type<tc>, window_params = [{transform_indices = @transform_0, window_bounds = array<i64: 8, 16>}, {pipeline_mode = #tpu.pipeline_mode<synchronous>, transform_indices = @transform_1, window_bounds = array<i64: 16, 128>}, {pipeline_mode = #tpu.pipeline_mode<synchronous>, transform_indices = @transform_2, window_bounds = array<i64: 1, 128>}, {pipeline_mode = #tpu.pipeline_mode<synchronous>, transform_indices = @transform_3, window_bounds = array<i64: 128, 128>}, {pipeline_mode = #tpu.pipeline_mode<synchronous>, transform_indices = @transform_4, window_bounds = array<i64: 1, 128>}, {transform_indices = @transform_5, window_bounds = array<i64: 8, 128>}]} {
    %c0 = arith.constant 0 : index
    %c0_0 = arith.constant 0 : index
    %0 = vector.load %arg1[%c0, %c0_0] : memref<8x16xbf16, #tpu.memory_space<vmem>>, vector<8x16xbf16>
    %c0_1 = arith.constant 0 : index
    %c0_2 = arith.constant 0 : index
    %1 = vector.load %arg2[%c0_1, %c0_2] : memref<16x128xbf16, #tpu.memory_space<vmem>>, vector<16x128xbf16>
    %cst = arith.constant dense<0.000000e+00> : vector<8x128xf32>
    %2 = tpu.matmul %0, %1, %cst {dimension_numbers = #tpu.dot_dimension_numbers<[1], [0], [0], [1], [0, 0, 1, 1], [], []>} : vector<8x16xbf16>, vector<16x128xbf16>, vector<8x128xf32> -> vector<8x128xf32>
    %c0_3 = arith.constant 0 : index
    %c0_4 = arith.constant 0 : index
    %3 = vector.load %arg3[%c0_3, %c0_4] : memref<1x128xf32, #tpu.memory_space<vmem>>, vector<1x128xf32>
    %4 = vector.broadcast %3 : vector<1x128xf32> to vector<8x128xf32>
    %5 = arith.addf %2, %4 : vector<8x128xf32>
    %cst_5 = arith.constant 0.000000e+00 : f32
    %6 = vector.broadcast %cst_5 : f32 to vector<8x128xf32>
    %7 = arith.maximumf %5, %6 : vector<8x128xf32>
    %8 = arith.truncf %7 : vector<8x128xf32> to vector<8x128xbf16>
    %c0_6 = arith.constant 0 : index
    %c0_7 = arith.constant 0 : index
    %9 = vector.load %arg4[%c0_6, %c0_7] : memref<128x128xbf16, #tpu.memory_space<vmem>>, vector<128x128xbf16>
    %cst_8 = arith.constant dense<0.000000e+00> : vector<8x128xf32>
    %10 = tpu.matmul %8, %9, %cst_8 {dimension_numbers = #tpu.dot_dimension_numbers<[1], [0], [0], [1], [0, 0, 1, 1], [], []>} : vector<8x128xbf16>, vector<128x128xbf16>, vector<8x128xf32> -> vector<8x128xf32>
    %c0_9 = arith.constant 0 : index
    %c0_10 = arith.constant 0 : index
    %11 = vector.load %arg5[%c0_9, %c0_10] : memref<1x128xf32, #tpu.memory_space<vmem>>, vector<1x128xf32>
    %12 = vector.broadcast %11 : vector<1x128xf32> to vector<8x128xf32>
    %13 = arith.addf %10, %12 : vector<8x128xf32>
    %c0_11 = arith.constant 0 : index
    %c0_12 = arith.constant 0 : index
    %14 = vector.load %arg6[%c0_11, %c0_12] : memref<8x128xf32, #tpu.memory_space<vmem>>, vector<8x128xf32>
    tpu.vector_store %arg6[%c0_11, %c0_12], %13 {strides = array<i32>} : memref<8x128xf32, #tpu.memory_space<vmem>>, vector<8x128xf32>,
    return
  }
  func.func @transform_0(%arg0: i32) -> (i32, i32) {
    %c0_i32 = arith.constant 0 : i32
    %c0_i32_0 = arith.constant 0 : i32
    return %arg0, %c0_i32 : i32, i32
  }
  func.func @transform_1(%arg0: i32) -> (i32, i32) {
    %c0_i32 = arith.constant 0 : i32
    %c0_i32_0 = arith.constant 0 : i32
    %c0_i32_1 = arith.constant 0 : i32
    return %c0_i32, %c0_i32_0 : i32, i32
  }
  func.func @transform_2(%arg0: i32) -> (i32, i32) {
    %c0_i32 = arith.constant 0 : i32
    %c0_i32_0 = arith.constant 0 : i32
    %c0_i32_1 = arith.constant 0 : i32
    return %c0_i32, %c0_i32_0 : i32, i32
  }
  func.func @transform_3(%arg0: i32) -> (i32, i32) {
    %c0_i32 = arith.constant 0 : i32
    %c0_i32_0 = arith.constant 0 : i32
    %c0_i32_1 = arith.constant 0 : i32
    return %c0_i32, %c0_i32_0 : i32, i32
  }
  func.func @transform_4(%arg0: i32) -> (i32, i32) {
    %c0_i32 = arith.constant 0 : i32
    %c0_i32_0 = arith.constant 0 : i32
    %c0_i32_1 = arith.constant 0 : i32
    return %c0_i32, %c0_i32_0 : i32, i32
  }
  func.func @transform_5(%arg0: i32) -> (i32, i32) {
    %c0_i32 = arith.constant 0 : i32
    %c0_i32_0 = arith.constant 0 : i32
    return %arg0, %c0_i32 : i32, i32
  }
}

</mosaic_0001>

<bundles_post_ra>
// kernel: qnetwork_forward.1
= control target key start
LH: loop header
LB: loop body
LE: loop exit
PB: predicated region body
PF: predicated region fallthrough
CT: control target
= control target key end

     0   :  { %v259_v0 = vmov 0.0   ;;  %vm260_vm0 = vmmov 0   ;;  %vm37_vm1 = vcmask 130048   ;;  %s330_s1 = inlined_call_operand.vmem [shape: bf16[16,128], index: 1, kind: input, shape index: {}]   ;;  %s331_s0 = inlined_call_operand.vmem [shape: bf16[8,16], index: 0, kind: input, shape index: {}]   ;;  %s332_s3 = inlined_call_operand.vmem [shape: bf16[128,128], index: 3, kind: input, shape index: {}]   ;;  %s333_s2 = inlined_call_operand.vmem [shape: f32[1,128], index: 2, kind: input, shape index: {}]   ;;  %s334_s4 = inlined_call_operand.vmem [shape: f32[1,128], index: 4, kind: input, shape index: {}]   ;;  %s335_s5 = inlined_call_operand.vmem [shape: f32[8,128], index: 5, kind: output, shape index: {}]  }
   0x1   :  { %222 = vmatprep.subr.bf16.mxu0 %v259_v0  ;;  %v250_v1 = vld [vmem:[%s330_s1] sm:$0xff]   ;;  %224 = vmatprep.mubr.msk.bf16.mxu0 %vm260_vm0, %v259_v0  ;;  %v252_v4 = vld [vmem:[%s332_s3 + $0x8] sm:$0xff]   ;;  %v253_v5 = vld [vmem:[%s332_s3 + $0x10] sm:$0xff]  }
   0x2   :  { %v21_v2 = vld [vmem:[%s331_s0] sm:$0xf]  ;;  %228 = vmatprep.subr.bf16.mxu1 %v259_v0  ;;  %244 = vmatprep.mubr.msk.bf16.mxu1 %vm260_vm0, %v259_v0  ;;  %v254_v6 = vld [vmem:[%s332_s3 + $0x18] sm:$0xff]   ;;  %v256_v8 = vld [vmem:[%s332_s3 + $0x28] sm:$0xff]  }
   0x3   :  { %223 = vmatpush3.bf16.msra.mxu0 %v250_v1  ;;  %v251_v3 = vld [vmem:[%s332_s3] sm:$0xff]   ;;  %v257_v9 = vld [vmem:[%s332_s3 + $0x30] sm:$0xff]   ;;  %v258_v10 = vld [vmem:[%s332_s3 + $0x38] sm:$0xff]  }
   0x4   :  { %229 = vmatpush3.bf16.msra.mxu1 %v251_v3  ;;  %v255_v7 = vld [vmem:[%s332_s3 + $0x20] sm:$0xff]  }
   0x5   :  { %230 = vmatprep.subr.bf16.mxu1 %v259_v0  ;;  %v199_v11 = vld [vmem:[%s333_s2] ss:$0 sm:$0xff] }
   0x6   :  { %225 = vmatmul.mubr.msk.bf16.vlgmr.msra.gmra.mrb[0].mxu0 %vm37_vm1, %v21_v2  ;;  %v202_v19 = vld [vmem:[%s334_s4] ss:$0 sm:$0xff] }
   0x8   :  { %231 = vmatpush3.bf16.msra.mxu1 %v252_v4 }
   0x9   :  { %232 = vmatprep.subr.bf16.mxu1 %v259_v0 }
   0xc   :  { %233 = vmatpush3.bf16.msra.mxu1 %v253_v5 }
   0xd   :  { %234 = vmatprep.subr.bf16.mxu1 %v259_v0 }
  0x10   :  { %235 = vmatpush3.bf16.msra.mxu1 %v254_v6 }
  0x11   :  { %236 = vmatprep.subr.bf16.mxu1 %v259_v0 }
  0x14   :  { %237 = vmatpush3.bf16.msra.mxu1 %v255_v7 }
  0x15   :  { %238 = vmatprep.subr.bf16.mxu1 %v259_v0 }
  0x18   :  { %239 = vmatpush3.bf16.msra.mxu1 %v256_v8 }
  0x19   :  { %240 = vmatprep.subr.bf16.mxu1 %v259_v0 }
  0x1c   :  { %241 = vmatpush3.bf16.msra.mxu1 %v257_v9 }
  0x1d   :  { %242 = vmatprep.subr.bf16.mxu1 %v259_v0 }
  0x20   :  { %243 = vmatpush3.bf16.msra.mxu1 %v258_v10 }
  0xd9   :  { %v75_v12 = vpop.f32.mrb[0].mxu0 }
  0xda   :  { %v76_v13 = vadd.f32 %v199_v11, %v75_v12  ;;  %v226_v14 = vpop.f32.mrb[1].mxu0 }
  0xdb   :  { %v78_v15 = vpop.f32.mrb[2].mxu0 }
  0xdc   :  { %v81_v16 = vmax.f32 %v76_v13, 0.0  ;;  %v227_v17 = vpop.f32.mrb[3].mxu0 }
  0xde   :  { %v82_v18 = vpack.c.bf16 %v81_v16, %v81_v16 }
  0xe0   :  { %245 = vmatmul.mubr.bf16.vlgmr.msra.gmra.mrb[0].mxu1 %v82_v18 }
 0x1b3   :  { %v188_v20 = vpop.f32.mrb[0].mxu1 }
 0x1b4   :  { %v189_v21 = vadd.f32 %v202_v19, %v188_v20  ;;  %v246_v22 = vpop.f32.mrb[1].mxu1 }
 0x1b5   :  { %v191_v23 = vpop.f32.mrb[2].mxu1 }
 0x1b6   :  { %194 = vst [vmem:[%s335_s5] sm:$0xff] %v189_v21  ;;  %v247_v24 = vpop.f32.mrb[3].mxu1 }

</bundles_post_ra>
